<compile_context>
chip_gen: v7x
topology: tpu7x:2x2x1
jax: 0.10.0
libtpu: 0.0.40
codegen_flags: <defaults>
</compile_context>

<pallas_src>
import functools
import math

import jax
import jax.numpy as jnp
from jax.experimental import pallas as pl
from jax.experimental.pallas import tpu as pltpu

_MXU_DTYPE = jnp.bfloat16          # matmul operand dtype (accumulation stays f32)
_W_DTYPE = jnp.bfloat16            # stored weight dtype
_ACT_DTYPE = jnp.bfloat16          # matmul-only intermediate activations
_VMEM_LIMIT = 48 * 1024 * 1024     # fits v7x's 64 MiB VMEM with headroom


def _pick_tile(dim, target, align):
    """Largest tile <= target that divides `dim` and is a multiple of `align`;
    falls back to the full dimension (always a legal block)."""
    if dim <= target:
        return dim
    t = (target // align) * align
    while t >= align:
        if dim % t == 0:
            return t
        t -= align
    return dim


# ----------------------------- Pallas kernels -------------------------------

def _linear_kernel(x_ref, w_ref, b_ref, o_ref, acc_ref, *, activation):
    # Tiled x[M,K] @ w[K,N] + b, accumulated in f32 scratch over the k grid axis.
    @pl.when(pl.program_id(2) == 0)
    def _():
        acc_ref[...] = jnp.zeros_like(acc_ref)

    acc_ref[...] += jnp.dot(x_ref[...].astype(_MXU_DTYPE), w_ref[...],
                            preferred_element_type=jnp.float32)

    @pl.when(pl.program_id(2) == pl.num_programs(2) - 1)
    def _():
        y = acc_ref[...] + b_ref[...]
        if activation == "gelu":
            # tanh-approx GELU (f32)
            # TODO(synk): HF DistilBERT uses exact (erf) GELU; tanh approx used here.
            c = math.sqrt(2.0 / math.pi)
            y = 0.5 * y * (1.0 + jnp.tanh(c * (y + 0.044715 * y * y * y)))
        o_ref[...] = y.astype(o_ref.dtype)


def _linear_res_ln_kernel(x_ref, w_ref, b_ref, r_ref, g_ref, bt_ref, o_ref,
                          acc_ref, *, eps):
    # Fused: (x @ w + b + residual) -> LayerNorm, written from the accumulator
    # at the last k step (no extra HBM round trip for the add+LN).
    @pl.when(pl.program_id(1) == 0)
    def _():
        acc_ref[...] = jnp.zeros_like(acc_ref)

    acc_ref[...] += jnp.dot(x_ref[...].astype(_MXU_DTYPE), w_ref[...],
                            preferred_element_type=jnp.float32)

    @pl.when(pl.program_id(1) == pl.num_programs(1) - 1)
    def _():
        h = acc_ref[...] + b_ref[...] + r_ref[...].astype(jnp.float32)
        mean = jnp.mean(h, axis=-1, keepdims=True)
        cen = h - mean
        var = jnp.mean(cen * cen, axis=-1, keepdims=True)
        y = cen * jax.lax.rsqrt(var + eps) * g_ref[...] + bt_ref[...]
        o_ref[...] = y.astype(o_ref.dtype)


def _ln_kernel(x_ref, g_ref, b_ref, o_ref, *, eps):
    # Plain LayerNorm (embedding LN), tiled over rows; stats in f32.
    h = x_ref[...].astype(jnp.float32)
    mean = jnp.mean(h, axis=-1, keepdims=True)
    cen = h - mean
    var = jnp.mean(cen * cen, axis=-1, keepdims=True)
    y = cen * jax.lax.rsqrt(var + eps) * g_ref[...] + b_ref[...]
    o_ref[...] = y.astype(o_ref.dtype)


def _attn_kernel(qkv_ref, bias_ref, o_ref, *, n_heads, head_dim, scale):
    # One batch element per grid step. Q|K|V heads are sliced out of the fused
    # QKV slab in VMEM (no HBM head split/merge transposes); the merged [S, D]
    # context is written in a single lane-dense store.
    D = n_heads * head_dim
    qkv = qkv_ref[0]                 # [S, 3D] bf16
    bias = bias_ref[0]               # [1, S]  additive mask bias (0 / -1e9), f32
    ctxs = []
    for h in range(n_heads):
        lo = h * head_dim
        q = qkv[:, lo:lo + head_dim].astype(_MXU_DTYPE)                   # [S, Dh]
        k = qkv[:, D + lo:D + lo + head_dim].astype(_MXU_DTYPE)           # [S, Dh]
        v = qkv[:, 2 * D + lo:2 * D + lo + head_dim].astype(_MXU_DTYPE)   # [S, Dh]
        s = jax.lax.dot_general(q, k, (((1,), (1,)), ((), ())),
                                preferred_element_type=jnp.float32)        # [S, S]
        s = s * scale + bias                                               # f32 epilogue
        s = s - jnp.max(s, axis=-1, keepdims=True)
        p = jnp.exp(s)
        inv = pl.reciprocal(jnp.sum(p, axis=-1, keepdims=True), approx=True)
        ctx = jnp.dot(p.astype(_MXU_DTYPE), v,
                      preferred_element_type=jnp.float32)                  # [S, Dh]
        ctxs.append(ctx * inv)       # normalize the small context, not the [S,S] probs
    o_ref[0] = jnp.concatenate(ctxs, axis=-1).astype(o_ref.dtype)


# ----------------------------- kernel wrappers -------------------------------

def linear(x, w, b, activation=None, out_dtype=None):
    M, K = x.shape
    N = w.shape[1]
    out_dtype = x.dtype if out_dtype is None else out_dtype
    tm = _pick_tile(M, 256, 8)
    tn = _pick_tile(N, 512, 128)
    tk = _pick_tile(K, 512, 128)
    return pl.pallas_call(
        functools.partial(_linear_kernel, activation=activation),
        out_shape=jax.ShapeDtypeStruct((M, N), out_dtype),
        grid=(M // tm, N // tn, K // tk),
        in_specs=[pl.BlockSpec((tm, tk), lambda i, j, k: (i, k)),
                  pl.BlockSpec((tk, tn), lambda i, j, k: (k, j)),
                  pl.BlockSpec((1, tn), lambda i, j, k: (0, j))],
        out_specs=pl.BlockSpec((tm, tn), lambda i, j, k: (i, j)),
        scratch_shapes=[pltpu.VMEM((tm, tn), jnp.float32)],
        compiler_params=pltpu.CompilerParams(
            dimension_semantics=("parallel", "parallel", "arbitrary"),
            vmem_limit_bytes=_VMEM_LIMIT),
    )(x, w, b.reshape(1, N))


def linear_residual_ln(x, w, b, residual, gamma, beta, eps=1e-12):
    # Fused matmul + bias + residual + LayerNorm (output N kept lane-dense).
    # Output dtype follows the residual stream (f32).
    M, K = x.shape
    N = w.shape[1]
    tm = _pick_tile(M, 256, 8)
    tk = _pick_tile(K, 512, 128)
    return pl.pallas_call(
        functools.partial(_linear_res_ln_kernel, eps=eps),
        out_shape=jax.ShapeDtypeStruct((M, N), residual.dtype),
        grid=(M // tm, K // tk),
        in_specs=[pl.BlockSpec((tm, tk), lambda i, k: (i, k)),
                  pl.BlockSpec((tk, N), lambda i, k: (k, 0)),
                  pl.BlockSpec((1, N), lambda i, k: (0, 0)),
                  pl.BlockSpec((tm, N), lambda i, k: (i, 0)),
                  pl.BlockSpec((1, N), lambda i, k: (0, 0)),
                  pl.BlockSpec((1, N), lambda i, k: (0, 0))],
        out_specs=pl.BlockSpec((tm, N), lambda i, k: (i, 0)),
        scratch_shapes=[pltpu.VMEM((tm, N), jnp.float32)],
        compiler_params=pltpu.CompilerParams(
            dimension_semantics=("parallel", "arbitrary"),
            vmem_limit_bytes=_VMEM_LIMIT),
    )(x, w, b.reshape(1, N), residual, gamma.reshape(1, N), beta.reshape(1, N))


def layernorm(x, gamma, beta, eps=1e-12):
    M, D = x.shape
    tm = _pick_tile(M, 512, 8)
    return pl.pallas_call(
        functools.partial(_ln_kernel, eps=eps),
        out_shape=jax.ShapeDtypeStruct((M, D), x.dtype),
        grid=(M // tm,),
        in_specs=[pl.BlockSpec((tm, D), lambda i: (i, 0)),
                  pl.BlockSpec((1, D), lambda i: (0, 0)),
                  pl.BlockSpec((1, D), lambda i: (0, 0))],
        out_specs=pl.BlockSpec((tm, D), lambda i: (i, 0)),
        compiler_params=pltpu.CompilerParams(
            dimension_semantics=("parallel",),
            vmem_limit_bytes=_VMEM_LIMIT),
    )(x, gamma.reshape(1, D), beta.reshape(1, D))


def mha_attention(qkv, mask_bias, n_heads):
    # qkv: [B, S, 3D] (fused Q|K|V, bf16); mask_bias: [B, 1, S] additive f32 bias.
    B, S, D3 = qkv.shape
    D = D3 // 3
    Dh = D // n_heads
    scale = 1.0 / math.sqrt(Dh)
    return pl.pallas_call(
        functools.partial(_attn_kernel, n_heads=n_heads, head_dim=Dh, scale=scale),
        out_shape=jax.ShapeDtypeStruct((B, S, D), qkv.dtype),
        grid=(B,),
        in_specs=[pl.BlockSpec((1, S, D3), lambda b: (b, 0, 0)),
                  pl.BlockSpec((1, 1, S), lambda b: (b, 0, 0))],
        out_specs=pl.BlockSpec((1, S, D), lambda b: (b, 0, 0)),
        compiler_params=pltpu.CompilerParams(
            dimension_semantics=("parallel",),
            vmem_limit_bytes=_VMEM_LIMIT),
    )(qkv, mask_bias)


# ----------------------------- model definition ------------------------------

def init_params(key, vocab, max_pos, dim, n_layers, ffn_dim):
    std = 0.02
    keys = iter(jax.random.split(key, 2 + 4 * n_layers))
    p = {
        "word_emb": jax.random.normal(next(keys), (vocab, dim), jnp.float32) * std,
        "pos_emb": jax.random.normal(next(keys), (max_pos, dim), jnp.float32) * std,
        "emb_ln_g": jnp.ones((dim,), jnp.float32),
        "emb_ln_b": jnp.zeros((dim,), jnp.float32),
        "layers": [],
    }
    for _ in range(n_layers):
        lyr = {}
        for name, (din, dout) in [("qkv", (dim, 3 * dim)),   # fused Q|K|V projection
                                  ("o", (dim, dim)),
                                  ("ffn1", (dim, ffn_dim)),
                                  ("ffn2", (ffn_dim, dim))]:
            w = jax.random.normal(next(keys), (din, dout), jnp.float32) * std
            lyr[name + "_w"] = w.astype(_W_DTYPE)
            lyr[name + "_b"] = jnp.zeros((dout,), jnp.float32)
        lyr["sa_ln_g"] = jnp.ones((dim,), jnp.float32)
        lyr["sa_ln_b"] = jnp.zeros((dim,), jnp.float32)
        lyr["out_ln_g"] = jnp.ones((dim,), jnp.float32)
        lyr["out_ln_b"] = jnp.zeros((dim,), jnp.float32)
        p["layers"].append(lyr)
    return p


def text_encoder_forward(params, input_ids, attention_mask, *, n_heads):
    """DistilBERT-style encoder forward; returns last_hidden_state[:, 0, :]."""
    B, S = input_ids.shape
    D = params["word_emb"].shape[1]
    M = B * S

    # Embedding gather + positional add (plain-JAX glue), then tiled LayerNorm.
    # TODO(synk): embedding-table gather stays in XLA (no clean rectangular BlockSpec).
    h = params["word_emb"][input_ids] + params["pos_emb"][jnp.arange(S)][None, :, :]
    h2 = layernorm(h.reshape(M, D), params["emb_ln_g"], params["emb_ln_b"])

    # Additive attention-mask bias computed once, reused by every layer/head.
    mask_bias = ((attention_mask.astype(jnp.float32) - 1.0) * 1e9).reshape(B, 1, S)

    for lyr in params["layers"]:
        x = h2                                                   # [M, D] f32
        qkv = linear(x, lyr["qkv_w"], lyr["qkv_b"],
                     out_dtype=_ACT_DTYPE)                       # fused QKV: [M, 3D] bf16
        ctx = mha_attention(qkv.reshape(B, S, 3 * D), mask_bias, n_heads)   # bf16
        h2 = linear_residual_ln(ctx.reshape(M, D), lyr["o_w"], lyr["o_b"],
                                x, lyr["sa_ln_g"], lyr["sa_ln_b"])          # f32
        ff = linear(h2, lyr["ffn1_w"], lyr["ffn1_b"], activation="gelu",
                    out_dtype=_ACT_DTYPE)                        # [M, 4D] bf16
        h2 = linear_residual_ln(ff, lyr["ffn2_w"], lyr["ffn2_b"],
                                h2, lyr["out_ln_g"], lyr["out_ln_b"])       # f32

    last_hidden_state = h2.reshape(B, S, D)
    # TextEncoder.target_token_idx = 0  (CLS token)
    return last_hidden_state[:, 0, :]


# ----------------------------------- main ------------------------------------

if __name__ == "__main__":
    VOCAB, MAX_POS = 100, 32
    DIM, N_LAYERS, N_HEADS, FFN = 32, 2, 4, 64
    B, S = 2, 8

    key = jax.random.PRNGKey(0)
    k_params, k_ids = jax.random.split(key)
    params = init_params(k_params, VOCAB, MAX_POS, DIM, N_LAYERS, FFN)

    input_ids = jax.random.randint(k_ids, (B, S), 0, VOCAB, dtype=jnp.int32)
    attention_mask = jnp.ones((B, S), jnp.int32).at[1, 6:].set(0)  # pad tail of seq 1

    out = text_encoder_forward(params, input_ids, attention_mask, n_heads=N_HEADS)
    out = jax.block_until_ready(out)
    assert out.shape == (B, DIM) and out.dtype == jnp.float32
    print("KERNEL_OK")
</pallas_src>

<mosaic_0001>
module attributes {stable_mosaic.version = 11 : i64} {
  func.func @_ln_kernel(%arg0: i32, %arg1: memref<16x32xf32, #tpu.memory_space<vmem>>, %arg2: memref<1x32xf32, #tpu.memory_space<vmem>>, %arg3: memref<1x32xf32, #tpu.memory_space<vmem>>, %arg4: memref<16x32xf32, #tpu.memory_space<vmem>>) attributes {dimension_semantics = [#tpu.dimension_semantics<parallel>], iteration_bounds = array<i64: 1>, scalar_prefetch = 0 : i64, scratch_operands = 0 : i64, tpu.core_type = #tpu.core_type<tc>, window_params = [{transform_indices = @transform_0, window_bounds = array<i64: 16, 32>}, {pipeline_mode = #tpu.pipeline_mode<synchronous>, transform_indices = @transform_1, window_bounds = array<i64: 1, 32>}, {pipeline_mode = #tpu.pipeline_mode<synchronous>, transform_indices = @transform_2, window_bounds = array<i64: 1, 32>}, {transform_indices = @transform_3, window_bounds = array<i64: 16, 32>}]} {
    %c0 = arith.constant 0 : index
    %c0_0 = arith.constant 0 : index
    %0 = vector.load %arg1[%c0, %c0_0] : memref<16x32xf32, #tpu.memory_space<vmem>>, vector<16x32xf32>
    %cst = arith.constant dense<0.000000e+00> : vector<16xf32>
    %1 = vector.multi_reduction <add>, %0, %cst [1] : vector<16x32xf32> to vector<16xf32>
    %2 = vector.shape_cast %1 : vector<16xf32> to vector<16x1xf32>
    %cst_1 = arith.constant 3.200000e+01 : f32
    %3 = vector.broadcast %cst_1 : f32 to vector<16x1xf32>
    %4 = arith.divf %2, %3 : vector<16x1xf32>
    %5 = vector.broadcast %4 : vector<16x1xf32> to vector<16x32xf32>
    %6 = arith.subf %0, %5 : vector<16x32xf32>
    %7 = arith.mulf %6, %6 : vector<16x32xf32>
    %cst_2 = arith.constant dense<0.000000e+00> : vector<16xf32>
    %8 = vector.multi_reduction <add>, %7, %cst_2 [1] : vector<16x32xf32> to vector<16xf32>
    %9 = vector.shape_cast %8 : vector<16xf32> to vector<16x1xf32>
    %cst_3 = arith.constant 3.200000e+01 : f32
    %10 = vector.broadcast %cst_3 : f32 to vector<16x1xf32>
    %11 = arith.divf %9, %10 : vector<16x1xf32>
    %cst_4 = arith.constant 9.99999996E-13 : f32
    %12 = vector.broadcast %cst_4 : f32 to vector<16x1xf32>
    %13 = arith.addf %11, %12 : vector<16x1xf32>
    %14 = math.rsqrt %13 : vector<16x1xf32>
    %15 = vector.broadcast %14 : vector<16x1xf32> to vector<16x32xf32>
    %16 = arith.mulf %6, %15 : vector<16x32xf32>
    %c0_5 = arith.constant 0 : index
    %c0_6 = arith.constant 0 : index
    %17 = vector.load %arg2[%c0_5, %c0_6] : memref<1x32xf32, #tpu.memory_space<vmem>>, vector<1x32xf32>
    %18 = vector.broadcast %17 : vector<1x32xf32> to vector<16x32xf32>
    %19 = arith.mulf %16, %18 : vector<16x32xf32>
    %c0_7 = arith.constant 0 : index
    %c0_8 = arith.constant 0 : index
    %20 = vector.load %arg3[%c0_7, %c0_8] : memref<1x32xf32, #tpu.memory_space<vmem>>, vector<1x32xf32>
    %21 = vector.broadcast %20 : vector<1x32xf32> to vector<16x32xf32>
    %22 = arith.addf %19, %21 : vector<16x32xf32>
    %c0_9 = arith.constant 0 : index
    %c0_10 = arith.constant 0 : index
    %23 = vector.load %arg4[%c0_9, %c0_10] : memref<16x32xf32, #tpu.memory_space<vmem>>, vector<16x32xf32>
    tpu.vector_store %arg4[%c0_9, %c0_10], %22 {strides = array<i32>} : memref<16x32xf32, #tpu.memory_space<vmem>>, vector<16x32xf32>,
    return
  }
  func.func @transform_0(%arg0: i32) -> (i32, i32) {
    %c0_i32 = arith.constant 0 : i32
    %c0_i32_0 = arith.constant 0 : i32
    return %arg0, %c0_i32 : i32, i32
  }
  func.func @transform_1(%arg0: i32) -> (i32, i32) {
    %c0_i32 = arith.constant 0 : i32
    %c0_i32_0 = arith.constant 0 : i32
    %c0_i32_1 = arith.constant 0 : i32
    return %c0_i32, %c0_i32_0 : i32, i32
  }
  func.func @transform_2(%arg0: i32) -> (i32, i32) {
    %c0_i32 = arith.constant 0 : i32
    %c0_i32_0 = arith.constant 0 : i32
    %c0_i32_1 = arith.constant 0 : i32
    return %c0_i32, %c0_i32_0 : i32, i32
  }
  func.func @transform_3(%arg0: i32) -> (i32, i32) {
    %c0_i32 = arith.constant 0 : i32
    %c0_i32_0 = arith.constant 0 : i32
    return %arg0, %c0_i32 : i32, i32
  }
}

</mosaic_0001>

<bundles_post_ra>
// kernel: tpu_custom_call.1
= control target key start
LH: loop header
LB: loop body
LE: loop exit
PB: predicated region body
PF: predicated region fallthrough
CT: control target
= control target key end

     0   :  { %8 = vsyncpa [#allocation3], 0  ;;  %s220_s0 = inlined_call_operand.hbm [shape: f32[16,32], index: 0, kind: input, shape index: {}]   ;;  %s221_s1 = inlined_call_operand.vmem [shape: f32[1,32], index: 1, kind: input, shape index: {}]   ;;  %s222_s2 = inlined_call_operand.vmem [shape: f32[1,32], index: 2, kind: input, shape index: {}]   ;;  %s223_s3 = inlined_call_operand.hbm [shape: f32[16,32], index: 3, kind: output, shape index: {}]  }
   0x1   :  { %9 = vsyncpa [#allocation4], 0  ;;  %s154_s12 = smov [#allocation2]   ;;  %s106_s16 = scalar_lea.hbm %s220_s0, 256 }
   0x2   :  { %s15_s13 = sshll.u32 %s154_s12, 4  ;;  %p107_p0 = scmp.ne.s32.totalorder %s220_s0, %s106_s16  ;;  %s16_s13 = int_to_ptr.vmem [resolvable:$true] %s15_s13 }
   0x3   :  { %p110_p1 = scmp.lt.u32.totalorder %s106_s16, %s220_s0 }
   0x5   :  { %p112_p2 = pnand %p110_p1, %p107_p0 }
   0x7   :  { %115 = shalt.err (!%p112_p2)
}
   0x8   :  { %s116_s21 = scalar_lea.vmem %s16_s13, 256  ;;  %p121_p4 = scmp.lt.s32.totalorder %s16_s13, %s16_s13 }
   0x9   :  { %p117_p3 = scmp.ne.s32.totalorder %s16_s13, %s116_s21  ;;  %p122_p5 = scmp.lt.s32.totalorder %s116_s21, %s116_s21 }
   0xb   :  { %p123_p6 = por %p122_p5, %p121_p4 }
   0xd   :  { %p124_p7 = pnand %p123_p6, %p117_p3 }
   0xf   :  { %127 = shalt.err (!%p124_p7)
}
  0x10   :  { %s155_s22 = smov 128   ;;  %s156_s23 = smov 8  }
  0x11   :  { %21 = dma.hbm_to_vmem [thread:$0]  %s220_s0, 256, %s16_s13, [#allocation3], %s155_s22, %s155_s22, %s156_s23  }
  0x12   :  { %150 = dma.done.wait [#allocation3], 256  }
  0x13   :  { %151 = vsyncadd [#allocation3], 4294967040  ;;  %vm31_vm0 = vcmask 261120   ;;  %v29_v0 = vld [vmem:[#allocation2] sm:$0xff]  ;;  %v30_v1 = vld [vmem:[#allocation2 + $0x8] sm:$0xff]  ;;  %s157_s29 = smov [#allocation5]  }
  0x14   :  { %v32_v2 = vsel %vm31_vm0, %v29_v0, 0.0  ;;  %v35_v3 = vsel %vm31_vm0, %v30_v1, 0.0  ;;  %v96_v21 = vld [vmem:[%s221_s1] ss:$0 sm:$0xff]  ;;  %s84_s30 = sshll.u32 %s157_s29, 4  ;;  %s85_s30 = int_to_ptr.vmem [resolvable:$true] %s84_s30 }
  0x15   :  { %33 = vadd.xlane.f32.xlu0 %v32_v2  ;;  %v97_v23 = vld [vmem:[%s222_s2] ss:$0 sm:$0xff]  ;;  %s128_s4 = scalar_lea.vmem %s85_s30, 256  ;;  %p133_p9 = scmp.lt.s32.totalorder %s85_s30, %s85_s30 }
  0x16   :  { %p129_p8 = scmp.ne.s32.totalorder %s85_s30, %s128_s4  ;;  %p134_p10 = scmp.lt.s32.totalorder %s128_s4, %s128_s4 }
  0x18   :  { %p135_p11 = por %p134_p10, %p133_p9 }
  0x19   :  { %36 = vadd.xlane.f32.xlu0 %v35_v3 }
  0x1a   :  { %p136_p12 = pnand %p135_p11, %p129_p8 }
  0xa2   :  { %v34_v4 = vpop.xlane.xlu0 %33 }
  0xa3   :  { %v39_v5 = vmul.f32 0.03125, %v34_v4 }
  0xa5   :  { %v41_v6 = vsub.f32 %v29_v0, %v39_v5 }
  0xa6   :  { %v37_v7 = vpop.xlane.xlu0 %36 }
  0xa7   :  { %v40_v8 = vmul.f32 0.03125, %v37_v7  ;;  %v43_v9 = vmul.f32 %v41_v6, %v41_v6 }
  0xa9   :  { %v42_v10 = vsub.f32 %v30_v1, %v40_v8  ;;  %v45_v11 = vsel %vm31_vm0, %v43_v9, 0.0 }
  0xaa   :  { %46 = vadd.xlane.f32.xlu1 %v45_v11 }
  0xab   :  { %v44_v12 = vmul.f32 %v42_v10, %v42_v10 }
  0xad   :  { %v48_v13 = vsel %vm31_vm0, %v44_v12, 0.0 }
  0xae   :  { %49 = vadd.xlane.f32.xlu1 %v48_v13 }
 0x137   :  { %v47_v14 = vpop.xlane.xlu1 %46 }
 0x138   :  { %v51_v15 = vmul.f32 0.03125, %v47_v14 }
 0x13a   :  { %v53_v16 = vadd.f32 1e-12, %v51_v15 }
 0x13b   :  { %v50_v17 = vpop.xlane.xlu1 %49 }
 0x13c   :  { %102 = vrsqrt.f32 %v53_v16  ;;  %v52_v18 = vmul.f32 0.03125, %v50_v17 }
 0x13e   :  { %v54_v19 = vadd.f32 1e-12, %v52_v18 }
 0x140   :  { %104 = vrsqrt.f32 %v54_v19 }
 0x146   :  { %v103_v20 = vpop.eup %102 }
 0x147   :  { %v57_v22 = vmul.f32 %v103_v20, %v41_v6 }
 0x149   :  { %v66_v24 = vmul.f32 %v96_v21, %v57_v22 }
 0x14a   :  { %v105_v25 = vpop.eup %104 }
 0x14b   :  { %v58_v26 = vmul.f32 %v105_v25, %v42_v10  ;;  %v75_v27 = vadd.f32 %v97_v23, %v66_v24 }
 0x14d   :  { %v67_v28 = vmul.f32 %v96_v21, %v58_v26  ;;  %77 = vst.msk [vmem:[#allocation5] sm:$0xff] %vm31_vm0, %v75_v27 }
 0x14f   :  { %v76_v29 = vadd.f32 %v97_v23, %v67_v28 }
 0x151   :  { %78 = vst.msk [vmem:[#allocation5 + $0x8] sm:$0xff] %vm31_vm0, %v76_v29 }
 0x152   :  { %139 = shalt.err (!%p136_p12)
}
 0x153   :  { %s140_s5 = scalar_lea.hbm %s223_s3, 256 }
 0x154   :  { %p141_p13 = scmp.ne.s32.totalorder %s223_s3, %s140_s5  ;;  %p144_p0 = scmp.lt.u32.totalorder %s140_s5, %s223_s3 }
 0x156   :  { %p146_p1 = pnand %p144_p0, %p141_p13 }
 0x158   :  { %149 = shalt.err (!%p146_p1)
}
 0x159   :  { %90 = dma.vmem_to_hbm [thread:$0]  %s85_s30, 256, %s223_s3, [#allocation4], %s155_s22, %s155_s22, %s156_s23  }
 0x15a   :  { %152 = dma.done.wait [#allocation4], 256  }
 0x15b   :  { %153 = vsyncadd [#allocation4], 4294967040 }
 0x15c   :  { %94 = vsyncpa [#allocation3], 1 }
 0x15d   :  { %95 = vsyncpa [#allocation4], 1 }

</bundles_post_ra>
